<compile_context>
chip_gen: v6e
topology: v6e:2x2x1
jax: 0.10.0
libtpu: 0.0.40
codegen_flags: <defaults>
</compile_context>

<pallas_src>
import functools

import jax
import jax.numpy as jnp
from jax import lax
from jax.experimental import pallas as pl
from jax.experimental.pallas import tpu as pltpu

LN_EPS = 1e-5  # torch.nn.LayerNorm default


def _round_up(x, m):
    return ((x + m - 1) // m) * m


def _layernorm(x, gamma, beta, inv_d):
    # Single-pass sum / sum-of-squares LayerNorm (biased variance, matches torch).
    s = jnp.sum(x, axis=-1, keepdims=True)
    sq = jnp.sum(x * x, axis=-1, keepdims=True)
    mu = s * inv_d
    var = jnp.maximum(sq * inv_d - mu * mu, 0.0)   # clamp: E[x^2]-E[x]^2 can dip < 0
    inv = lax.rsqrt(var + LN_EPS)                  # EUP
    return (x - mu) * inv * gamma + beta


def actor_kernel(x_ref,
                 w1_ref, b1_ref, g1_ref, be1_ref,
                 w2_ref, b2_ref, g2_ref, be2_ref,
                 w3_ref, b3_ref,
                 o_ref, *, inv_d1, inv_d2):
    x = x_ref[...]                                                     # (TILE_B, S)

    # fc1 -> ln1 -> relu
    h1 = jnp.dot(x, w1_ref[...], preferred_element_type=jnp.float32) + b1_ref[...]
    h1 = jnp.maximum(_layernorm(h1, g1_ref[...], be1_ref[...], inv_d1), 0.0)

    # fc2 -> ln2 -> relu
    h2 = jnp.dot(h1, w2_ref[...], preferred_element_type=jnp.float32) + b2_ref[...]
    h2 = jnp.maximum(_layernorm(h2, g2_ref[...], be2_ref[...], inv_d2), 0.0)

    # action head -> tanh (output written at true action_dim width)
    a = jnp.dot(h2, w3_ref[...], preferred_element_type=jnp.float32) + b3_ref[...]
    o_ref[...] = jnp.tanh(a).astype(o_ref.dtype)                       # EUP


def actor_forward(state, params, *, tile_b=4096):
    """state: (B, state_dim) f32. params: dict of weights (see init_params)."""
    B, state_dim = state.shape
    fc1_dim = params["w1"].shape[1]
    fc2_dim = params["w2"].shape[1]
    action_dim = params["w3"].shape[1]

    # --- batch tiling: pad B to a multiple of 8 only, then even-split.
    B8 = _round_up(B, 8)
    max_tile = max(8, min(tile_b, B8))
    n_tiles = pl.cdiv(B8, max_tile)
    if B8 >= 16 and n_tiles < 2:
        n_tiles = 2                      # >=2 steps so v7x can use both TensorCores
    TILE_B = _round_up(pl.cdiv(B8, n_tiles), 8)
    n_tiles = pl.cdiv(B8, TILE_B)
    B_pad = n_tiles * TILE_B
    if B_pad != B:
        state = jnp.pad(state, ((0, B_pad - B), (0, 0)))

    weights = (
        params["w1"], params["b1"], params["g1"], params["be1"],
        params["w2"], params["b2"], params["g2"], params["be2"],
        params["w3"], params["b3"],
    )

    # Weights/biases: full-extent blocks, resident across all batch tiles.
    weight_specs = [pl.BlockSpec(w.shape, lambda i: (0, 0)) for w in weights]

    kernel = functools.partial(actor_kernel,
                               inv_d1=1.0 / fc1_dim,
                               inv_d2=1.0 / fc2_dim)

    flops = 2 * B_pad * (state_dim * fc1_dim + fc1_dim * fc2_dim + fc2_dim * action_dim)
    transcendentals = B_pad * (2 + action_dim)       # 2 rsqrt/row + tanh per output elem
    bytes_accessed = 4 * (
        B_pad * state_dim + B_pad * action_dim + sum(int(w.size) for w in weights)
    )

    out = pl.pallas_call(
        kernel,
        out_shape=jax.ShapeDtypeStruct((B_pad, action_dim), jnp.float32),
        grid=(n_tiles,),
        in_specs=[pl.BlockSpec((TILE_B, state_dim), lambda i: (i, 0))] + weight_specs,
        out_specs=pl.BlockSpec((TILE_B, action_dim), lambda i: (i, 0)),
        compiler_params=pltpu.CompilerParams(
            dimension_semantics=("parallel",),
        ),
        cost_estimate=pl.CostEstimate(
            flops=flops,
            transcendentals=transcendentals,
            bytes_accessed=bytes_accessed,
        ),
    )(state, *weights)

    # Only a (cheap, action_dim-wide) row slice when B needed sublane padding.
    return out if B_pad == B else out[:B]


def init_params(key, state_dim, fc1_dim, fc2_dim, action_dim):
    """Deterministic synthetic init (PyTorch-like uniform fan-in scaling)."""
    ks = jax.random.split(key, 6)

    def linear(kw, kb, fan_in, fan_out):
        bound = 1.0 / jnp.sqrt(fan_in)
        w = jax.random.uniform(kw, (fan_in, fan_out), jnp.float32, -bound, bound)
        b = jax.random.uniform(kb, (1, fan_out), jnp.float32, -bound, bound)
        return w, b

    w1, b1 = linear(ks[0], ks[1], state_dim, fc1_dim)
    w2, b2 = linear(ks[2], ks[3], fc1_dim, fc2_dim)
    w3, b3 = linear(ks[4], ks[5], fc2_dim, action_dim)
    return {
        "w1": w1, "b1": b1,
        "g1": jnp.ones((1, fc1_dim), jnp.float32), "be1": jnp.zeros((1, fc1_dim), jnp.float32),
        "w2": w2, "b2": b2,
        "g2": jnp.ones((1, fc2_dim), jnp.float32), "be2": jnp.zeros((1, fc2_dim), jnp.float32),
        "w3": w3, "b3": b3,
    }


def actor_forward_ref(state, p):
    """Pure-JAX reference for correctness check."""
    def ln(x, g, b):
        mu = jnp.mean(x, axis=-1, keepdims=True)
        var = jnp.mean((x - mu) ** 2, axis=-1, keepdims=True)
        return (x - mu) / jnp.sqrt(var + LN_EPS) * g + b
    h1 = jnp.maximum(ln(state @ p["w1"] + p["b1"], p["g1"], p["be1"]), 0.0)
    h2 = jnp.maximum(ln(h1 @ p["w2"] + p["b2"], p["g2"], p["be2"]), 0.0)
    return jnp.tanh(h2 @ p["w3"] + p["b3"])


if __name__ == "__main__":
    key = jax.random.PRNGKey(0)
    k_state, k_params, k_big = jax.random.split(key, 3)

    # Small shapes consistent with the module's forward.
    batch, state_dim, fc1_dim, fc2_dim, action_dim = 4, 16, 64, 32, 8
    state = jax.random.normal(k_state, (batch, state_dim), jnp.float32)
    params = init_params(k_params, state_dim, fc1_dim, fc2_dim, action_dim)

    out = jax.block_until_ready(actor_forward(state, params))
    ref = actor_forward_ref(state, params)
    assert out.shape == (batch, action_dim)
    assert jnp.allclose(out, ref, atol=1e-5, rtol=1e-5), "mismatch vs reference (small batch)"

    # Exercise the batch grid: default tile -> 2 even tiles + row padding.
    big_batch = 300
    big_state = jax.random.normal(k_big, (big_batch, state_dim), jnp.float32)
    big_ref = actor_forward_ref(big_state, params)

    big_out = jax.block_until_ready(actor_forward(big_state, params))
    assert big_out.shape == (big_batch, action_dim)
    assert jnp.allclose(big_out, big_ref, atol=1e-5, rtol=1e-5), "mismatch vs reference (2-tile grid)"

    # Exercise a multi-tile grid explicitly (3 tiles of 104 rows).
    big_out2 = jax.block_until_ready(actor_forward(big_state, params, tile_b=128))
    assert big_out2.shape == (big_batch, action_dim)
    assert jnp.allclose(big_out2, big_ref, atol=1e-5, rtol=1e-5), "mismatch vs reference (3-tile grid)"

    print("KERNEL_OK")
</pallas_src>

<mosaic_0001>
module attributes {stable_mosaic.version = 11 : i64} {
  func.func @actor_kernel(%arg0: i32, %arg1: memref<8x16xf32, #tpu.memory_space<vmem>>, %arg2: memref<16x64xf32, #tpu.memory_space<vmem>>, %arg3: memref<1x64xf32, #tpu.memory_space<vmem>>, %arg4: memref<1x64xf32, #tpu.memory_space<vmem>>, %arg5: memref<1x64xf32, #tpu.memory_space<vmem>>, %arg6: memref<64x32xf32, #tpu.memory_space<vmem>>, %arg7: memref<1x32xf32, #tpu.memory_space<vmem>>, %arg8: memref<1x32xf32, #tpu.memory_space<vmem>>, %arg9: memref<1x32xf32, #tpu.memory_space<vmem>>, %arg10: memref<32x8xf32, #tpu.memory_space<vmem>>, %arg11: memref<1x8xf32, #tpu.memory_space<vmem>>, %arg12: memref<8x8xf32, #tpu.memory_space<vmem>>) attributes {dimension_semantics = [#tpu.dimension_semantics<parallel>], iteration_bounds = array<i64: 1>, scalar_prefetch = 0 : i64, scratch_operands = 0 : i64, tpu.core_type = #tpu.core_type<tc>, window_params = [{transform_indices = @transform_0, window_bounds = array<i64: 8, 16>}, {pipeline_mode = #tpu.pipeline_mode<synchronous>, transform_indices = @transform_1, window_bounds = array<i64: 16, 64>}, {pipeline_mode = #tpu.pipeline_mode<synchronous>, transform_indices = @transform_2, window_bounds = array<i64: 1, 64>}, {pipeline_mode = #tpu.pipeline_mode<synchronous>, transform_indices = @transform_3, window_bounds = array<i64: 1, 64>}, {pipeline_mode = #tpu.pipeline_mode<synchronous>, transform_indices = @transform_4, window_bounds = array<i64: 1, 64>}, {pipeline_mode = #tpu.pipeline_mode<synchronous>, transform_indices = @transform_5, window_bounds = array<i64: 64, 32>}, {pipeline_mode = #tpu.pipeline_mode<synchronous>, transform_indices = @transform_6, window_bounds = array<i64: 1, 32>}, {pipeline_mode = #tpu.pipeline_mode<synchronous>, transform_indices = @transform_7, window_bounds = array<i64: 1, 32>}, {pipeline_mode = #tpu.pipeline_mode<synchronous>, transform_indices = @transform_8, window_bounds = array<i64: 1, 32>}, {pipeline_mode = #tpu.pipeline_mode<synchronous>, transform_indices = @transform_9, window_bounds = array<i64: 32, 8>}, {pipeline_mode = #tpu.pipeline_mode<synchronous>, transform_indices = @transform_10, window_bounds = array<i64: 1, 8>}, {transform_indices = @transform_11, window_bounds = array<i64: 8, 8>}]} {
    %c0 = arith.constant 0 : index
    %c0_0 = arith.constant 0 : index
    %0 = vector.load %arg1[%c0, %c0_0] : memref<8x16xf32, #tpu.memory_space<vmem>>, vector<8x16xf32>
    %c0_1 = arith.constant 0 : index
    %c0_2 = arith.constant 0 : index
    %1 = vector.load %arg2[%c0_1, %c0_2] : memref<16x64xf32, #tpu.memory_space<vmem>>, vector<16x64xf32>
    %cst = arith.constant dense<0.000000e+00> : vector<8x64xf32>
    %2 = tpu.matmul %0, %1, %cst {dimension_numbers = #tpu.dot_dimension_numbers<[1], [0], [0], [1], [0, 0, 1, 1], [], []>} : vector<8x16xf32>, vector<16x64xf32>, vector<8x64xf32> -> vector<8x64xf32>
    %c0_3 = arith.constant 0 : index
    %c0_4 = arith.constant 0 : index
    %3 = vector.load %arg3[%c0_3, %c0_4] : memref<1x64xf32, #tpu.memory_space<vmem>>, vector<1x64xf32>
    %4 = vector.broadcast %3 : vector<1x64xf32> to vector<8x64xf32>
    %5 = arith.addf %2, %4 : vector<8x64xf32>
    %c0_5 = arith.constant 0 : index
    %c0_6 = arith.constant 0 : index
    %6 = vector.load %arg4[%c0_5, %c0_6] : memref<1x64xf32, #tpu.memory_space<vmem>>, vector<1x64xf32>
    %c0_7 = arith.constant 0 : index
    %c0_8 = arith.constant 0 : index
    %7 = vector.load %arg5[%c0_7, %c0_8] : memref<1x64xf32, #tpu.memory_space<vmem>>, vector<1x64xf32>
    %cst_9 = arith.constant dense<0.000000e+00> : vector<8xf32>
    %8 = vector.multi_reduction <add>, %5, %cst_9 [1] : vector<8x64xf32> to vector<8xf32>
    %9 = vector.shape_cast %8 : vector<8xf32> to vector<8x1xf32>
    %10 = arith.mulf %5, %5 : vector<8x64xf32>
    %cst_10 = arith.constant dense<0.000000e+00> : vector<8xf32>
    %11 = vector.multi_reduction <add>, %10, %cst_10 [1] : vector<8x64xf32> to vector<8xf32>
    %12 = vector.shape_cast %11 : vector<8xf32> to vector<8x1xf32>
    %cst_11 = arith.constant 1.562500e-02 : f32
    %13 = vector.broadcast %cst_11 : f32 to vector<8x1xf32>
    %14 = arith.mulf %9, %13 : vector<8x1xf32>
    %cst_12 = arith.constant 1.562500e-02 : f32
    %15 = vector.broadcast %cst_12 : f32 to vector<8x1xf32>
    %16 = arith.mulf %12, %15 : vector<8x1xf32>
    %17 = arith.mulf %14, %14 : vector<8x1xf32>
    %18 = arith.subf %16, %17 : vector<8x1xf32>
    %cst_13 = arith.constant 0.000000e+00 : f32
    %19 = vector.broadcast %cst_13 : f32 to vector<8x1xf32>
    %20 = arith.maximumf %18, %19 : vector<8x1xf32>
    %cst_14 = arith.constant 9.99999974E-6 : f32
    %21 = vector.broadcast %cst_14 : f32 to vector<8x1xf32>
    %22 = arith.addf %20, %21 : vector<8x1xf32>
    %23 = math.rsqrt %22 : vector<8x1xf32>
    %24 = vector.broadcast %14 : vector<8x1xf32> to vector<8x64xf32>
    %25 = arith.subf %5, %24 : vector<8x64xf32>
    %26 = vector.broadcast %23 : vector<8x1xf32> to vector<8x64xf32>
    %27 = arith.mulf %25, %26 : vector<8x64xf32>
    %28 = vector.broadcast %6 : vector<1x64xf32> to vector<8x64xf32>
    %29 = arith.mulf %27, %28 : vector<8x64xf32>
    %30 = vector.broadcast %7 : vector<1x64xf32> to vector<8x64xf32>
    %31 = arith.addf %29, %30 : vector<8x64xf32>
    %cst_15 = arith.constant 0.000000e+00 : f32
    %32 = vector.broadcast %cst_15 : f32 to vector<8x64xf32>
    %33 = arith.maximumf %31, %32 : vector<8x64xf32>
    %c0_16 = arith.constant 0 : index
    %c0_17 = arith.constant 0 : index
    %34 = vector.load %arg6[%c0_16, %c0_17] : memref<64x32xf32, #tpu.memory_space<vmem>>, vector<64x32xf32>
    %cst_18 = arith.constant dense<0.000000e+00> : vector<8x32xf32>
    %35 = tpu.matmul %33, %34, %cst_18 {dimension_numbers = #tpu.dot_dimension_numbers<[1], [0], [0], [1], [0, 0, 1, 1], [], []>} : vector<8x64xf32>, vector<64x32xf32>, vector<8x32xf32> -> vector<8x32xf32>
    %c0_19 = arith.constant 0 : index
    %c0_20 = arith.constant 0 : index
    %36 = vector.load %arg7[%c0_19, %c0_20] : memref<1x32xf32, #tpu.memory_space<vmem>>, vector<1x32xf32>
    %37 = vector.broadcast %36 : vector<1x32xf32> to vector<8x32xf32>
    %38 = arith.addf %35, %37 : vector<8x32xf32>
    %c0_21 = arith.constant 0 : index
    %c0_22 = arith.constant 0 : index
    %39 = vector.load %arg8[%c0_21, %c0_22] : memref<1x32xf32, #tpu.memory_space<vmem>>, vector<1x32xf32>
    %c0_23 = arith.constant 0 : index
    %c0_24 = arith.constant 0 : index
    %40 = vector.load %arg9[%c0_23, %c0_24] : memref<1x32xf32, #tpu.memory_space<vmem>>, vector<1x32xf32>
    %cst_25 = arith.constant dense<0.000000e+00> : vector<8xf32>
    %41 = vector.multi_reduction <add>, %38, %cst_25 [1] : vector<8x32xf32> to vector<8xf32>
    %42 = vector.shape_cast %41 : vector<8xf32> to vector<8x1xf32>
    %43 = arith.mulf %38, %38 : vector<8x32xf32>
    %cst_26 = arith.constant dense<0.000000e+00> : vector<8xf32>
    %44 = vector.multi_reduction <add>, %43, %cst_26 [1] : vector<8x32xf32> to vector<8xf32>
    %45 = vector.shape_cast %44 : vector<8xf32> to vector<8x1xf32>
    %cst_27 = arith.constant 3.125000e-02 : f32
    %46 = vector.broadcast %cst_27 : f32 to vector<8x1xf32>
    %47 = arith.mulf %42, %46 : vector<8x1xf32>
    %cst_28 = arith.constant 3.125000e-02 : f32
    %48 = vector.broadcast %cst_28 : f32 to vector<8x1xf32>
    %49 = arith.mulf %45, %48 : vector<8x1xf32>
    %50 = arith.mulf %47, %47 : vector<8x1xf32>
    %51 = arith.subf %49, %50 : vector<8x1xf32>
    %cst_29 = arith.constant 0.000000e+00 : f32
    %52 = vector.broadcast %cst_29 : f32 to vector<8x1xf32>
    %53 = arith.maximumf %51, %52 : vector<8x1xf32>
    %cst_30 = arith.constant 9.99999974E-6 : f32
    %54 = vector.broadcast %cst_30 : f32 to vector<8x1xf32>
    %55 = arith.addf %53, %54 : vector<8x1xf32>
    %56 = math.rsqrt %55 : vector<8x1xf32>
    %57 = vector.broadcast %47 : vector<8x1xf32> to vector<8x32xf32>
    %58 = arith.subf %38, %57 : vector<8x32xf32>
    %59 = vector.broadcast %56 : vector<8x1xf32> to vector<8x32xf32>
    %60 = arith.mulf %58, %59 : vector<8x32xf32>
    %61 = vector.broadcast %39 : vector<1x32xf32> to vector<8x32xf32>
    %62 = arith.mulf %60, %61 : vector<8x32xf32>
    %63 = vector.broadcast %40 : vector<1x32xf32> to vector<8x32xf32>
    %64 = arith.addf %62, %63 : vector<8x32xf32>
    %cst_31 = arith.constant 0.000000e+00 : f32
    %65 = vector.broadcast %cst_31 : f32 to vector<8x32xf32>
    %66 = arith.maximumf %64, %65 : vector<8x32xf32>
    %c0_32 = arith.constant 0 : index
    %c0_33 = arith.constant 0 : index
    %67 = vector.load %arg10[%c0_32, %c0_33] : memref<32x8xf32, #tpu.memory_space<vmem>>, vector<32x8xf32>
    %cst_34 = arith.constant dense<0.000000e+00> : vector<8x8xf32>
    %68 = tpu.matmul %66, %67, %cst_34 {dimension_numbers = #tpu.dot_dimension_numbers<[1], [0], [0], [1], [0, 0, 1, 1], [], []>} : vector<8x32xf32>, vector<32x8xf32>, vector<8x8xf32> -> vector<8x8xf32>
    %c0_35 = arith.constant 0 : index
    %c0_36 = arith.constant 0 : index
    %69 = vector.load %arg11[%c0_35, %c0_36] : memref<1x8xf32, #tpu.memory_space<vmem>>, vector<1x8xf32>
    %70 = vector.broadcast %69 : vector<1x8xf32> to vector<8x8xf32>
    %71 = arith.addf %68, %70 : vector<8x8xf32>
    %72 = math.tanh %71 : vector<8x8xf32>
    %c0_37 = arith.constant 0 : index
    %c0_38 = arith.constant 0 : index
    %73 = vector.load %arg12[%c0_37, %c0_38] : memref<8x8xf32, #tpu.memory_space<vmem>>, vector<8x8xf32>
    tpu.vector_store %arg12[%c0_37, %c0_38], %72 {strides = array<i32>} : memref<8x8xf32, #tpu.memory_space<vmem>>, vector<8x8xf32>,
    return
  }
  func.func @transform_0(%arg0: i32) -> (i32, i32) {
    %c0_i32 = arith.constant 0 : i32
    %c0_i32_0 = arith.constant 0 : i32
    return %arg0, %c0_i32 : i32, i32
  }
  func.func @transform_1(%arg0: i32) -> (i32, i32) {
    %c0_i32 = arith.constant 0 : i32
    %c0_i32_0 = arith.constant 0 : i32
    %c0_i32_1 = arith.constant 0 : i32
    return %c0_i32, %c0_i32_0 : i32, i32
  }
  func.func @transform_2(%arg0: i32) -> (i32, i32) {
    %c0_i32 = arith.constant 0 : i32
    %c0_i32_0 = arith.constant 0 : i32
    %c0_i32_1 = arith.constant 0 : i32
    return %c0_i32, %c0_i32_0 : i32, i32
  }
  func.func @transform_3(%arg0: i32) -> (i32, i32) {
    %c0_i32 = arith.constant 0 : i32
    %c0_i32_0 = arith.constant 0 : i32
    %c0_i32_1 = arith.constant 0 : i32
    return %c0_i32, %c0_i32_0 : i32, i32
  }
  func.func @transform_4(%arg0: i32) -> (i32, i32) {
    %c0_i32 = arith.constant 0 : i32
    %c0_i32_0 = arith.constant 0 : i32
    %c0_i32_1 = arith.constant 0 : i32
    return %c0_i32, %c0_i32_0 : i32, i32
  }
  func.func @transform_5(%arg0: i32) -> (i32, i32) {
    %c0_i32 = arith.constant 0 : i32
    %c0_i32_0 = arith.constant 0 : i32
    %c0_i32_1 = arith.constant 0 : i32
    return %c0_i32, %c0_i32_0 : i32, i32
  }
  func.func @transform_6(%arg0: i32) -> (i32, i32) {
    %c0_i32 = arith.constant 0 : i32
    %c0_i32_0 = arith.constant 0 : i32
    %c0_i32_1 = arith.constant 0 : i32
    return %c0_i32, %c0_i32_0 : i32, i32
  }
  func.func @transform_7(%arg0: i32) -> (i32, i32) {
    %c0_i32 = arith.constant 0 : i32
    %c0_i32_0 = arith.constant 0 : i32
    %c0_i32_1 = arith.constant 0 : i32
    return %c0_i32, %c0_i32_0 : i32, i32
  }
  func.func @transform_8(%arg0: i32) -> (i32, i32) {
    %c0_i32 = arith.constant 0 : i32
    %c0_i32_0 = arith.constant 0 : i32
    %c0_i32_1 = arith.constant 0 : i32
    return %c0_i32, %c0_i32_0 : i32, i32
  }
  func.func @transform_9(%arg0: i32) -> (i32, i32) {
    %c0_i32 = arith.constant 0 : i32
    %c0_i32_0 = arith.constant 0 : i32
    %c0_i32_1 = arith.constant 0 : i32
    return %c0_i32, %c0_i32_0 : i32, i32
  }
  func.func @transform_10(%arg0: i32) -> (i32, i32) {
    %c0_i32 = arith.constant 0 : i32
    %c0_i32_0 = arith.constant 0 : i32
    %c0_i32_1 = arith.constant 0 : i32
    return %c0_i32, %c0_i32_0 : i32, i32
  }
  func.func @transform_11(%arg0: i32) -> (i32, i32) {
    %c0_i32 = arith.constant 0 : i32
    %c0_i32_0 = arith.constant 0 : i32
    return %arg0, %c0_i32 : i32, i32
  }
}

</mosaic_0001>

<bundles_post_ra>
// kernel: tpu_custom_call.1
= control target key start
LH: loop header
LB: loop body
LE: loop exit
PB: predicated region body
PF: predicated region fallthrough
CT: control target
= control target key end

     0   :  { %v475_v1 = vmov 0.0   ;;  %vm476_vm0 = vmmov 0   ;;  %s630_s0 = inlined_call_operand.vmem [shape: f32[8,16], index: 0, kind: input, shape index: {}]   ;;  %s631_s1 = inlined_call_operand.vmem [shape: f32[16,64], index: 1, kind: input, shape index: {}]   ;;  %s632_s2 = inlined_call_operand.vmem [shape: f32[1,64], index: 2, kind: input, shape index: {}]   ;;  %s633_s3 = inlined_call_operand.vmem [shape: f32[1,64], index: 3, kind: input, shape index: {}]   ;;  %s634_s4 = inlined_call_operand.vmem [shape: f32[1,64], index: 4, kind: input, shape index: {}]   ;;  %s635_s5 = inlined_call_operand.vmem [shape: f32[64,32], index: 5, kind: input, shape index: {}]   ;;  %s636_s6 = inlined_call_operand.vmem [shape: f32[1,32], index: 6, kind: input, shape index: {}]   ;;  %s637_s7 = inlined_call_operand.vmem [shape: f32[1,32], index: 7, kind: input, shape index: {}]   ;;  %s638_s8 = inlined_call_operand.vmem [shape: f32[1,32], index: 8, kind: input, shape index: {}]   ;;  %s639_s9 = inlined_call_operand.vmem [shape: f32[32,8], index: 9, kind: input, shape index: {}]   ;;  %s640_s10 = inlined_call_operand.vmem [shape: f32[1,8], index: 10, kind: input, shape index: {}]   ;;  %s641_s11 = inlined_call_operand.hbm [shape: f32[8,8], index: 11, kind: output, shape index: {}]  }
   0x1   :  { %v41_v0 = vld [vmem:[%s631_s1 + $0x8] sm:$0xff]  ;;  %407 = vmatprep.subr.mxu0 %v475_v1  ;;  %v40_v2 = vld [vmem:[%s631_s1] sm:$0xff]  ;;  %411 = vmatprep.mubr.msk.f32.mxu0 %vm476_vm0, %v475_v1 }
   0x2   :  { %16 = vsyncpa [#allocation3], 0  ;;  %408 = vmatpush3.msra.mxu0 %v41_v0  ;;  %v39_v3 = vld [vmem:[%s630_s0] sm:$0xff]  ;;  %vm49_vm1 = vcmask 130048   ;;  %414 = vmatprep.subr.mxu1 %v475_v1  ;;  %vm125_vm2 = vcmask 523264   ;;  %v164_v11 = vld [vmem:[%s635_s5 + $0x38] sm:$0xff] }
   0x3   :  { %409 = vmatprep.subr.mxu0 %v475_v1  ;;  %430 = vmatprep.mubr.msk.f32.mxu1 %vm476_vm0, %v475_v1  ;;  %v380_v4 = vld [vmem:[%s632_s2] ss:$0 sm:$0xff]  ;;  %v163_v12 = vld [vmem:[%s635_s5 + $0x30] sm:$0xff]  ;;  %v162_v13 = vld [vmem:[%s635_s5 + $0x28] sm:$0xff]  ;;  %vm247_vm3 = vcmask 261120   ;;  %s477_s12 = smov [#allocation2]  }
   0x4   :  { %410 = vmatpush3.msra.mxu0 %v40_v2  ;;  %415 = vmatpush3.msra.mxu1 %v164_v11  ;;  %v161_v14 = vld [vmem:[%s635_s5 + $0x20] sm:$0xff]  ;;  %v160_v15 = vld [vmem:[%s635_s5 + $0x18] sm:$0xff]  ;;  %v159_v16 = vld [vmem:[%s635_s5 + $0x10] sm:$0xff]  ;;  %vm364_vm4 = vcmask 64512  }
   0x5   :  { %412 = vmatmul.mubr.msk.f32.vlgmr.msra.gmra.mxu0 %vm49_vm1, %v39_v3  ;;  %433 = vmatprep.subr.mxu0 %v475_v1  ;;  %v158_v17 = vld [vmem:[%s635_s5 + $0x8] sm:$0xff]  ;;  %v157_v18 = vld [vmem:[%s635_s5] sm:$0xff]  ;;  %v282_v42 = vld [vmem:[%s639_s9 + $0x18] sm:$0xff] }
   0x6   :  { %441 = vmatprep.mubr.msk.f32.mxu0 %vm476_vm0, %v475_v1  ;;  %416 = vmatprep.subr.mxu1 %v475_v1  ;;  %v382_v29 = vld [vmem:[%s633_s3] ss:$0 sm:$0xff]  ;;  %v281_v43 = vld [vmem:[%s639_s9 + $0x10] sm:$0xff]  ;;  %v280_v44 = vld [vmem:[%s639_s9 + $0x8] sm:$0xff] }
   0x7   :  { %417 = vmatpush3.msra.mxu1 %v163_v12  ;;  %v383_v31 = vld [vmem:[%s634_s4] ss:$0 sm:$0xff]  ;;  %434 = vmatpush3.msra.mxu0 %v282_v42 }
   0x8   :  { %418 = vmatprep.subr.mxu1 %v475_v1  ;;  %v384_v35 = vld [vmem:[%s636_s6] ss:$0 sm:$0xff]  ;;  %435 = vmatprep.subr.mxu0 %v475_v1 }
   0x9   :  { %419 = vmatpush3.msra.mxu1 %v162_v13  ;;  %436 = vmatpush3.msra.mxu0 %v281_v43  ;;  %v279_v45 = vld [vmem:[%s639_s9] sm:$0xff] }
   0xa   :  { %420 = vmatprep.subr.mxu1 %v475_v1  ;;  %437 = vmatprep.subr.mxu0 %v475_v1  ;;  %v386_v56 = vld [vmem:[%s637_s7] ss:$0 sm:$0xff]  ;;  %s372_s7 = sshll.u32 %s477_s12, 4  ;;  %s373_s7 = int_to_ptr.vmem [resolvable:$true] %s372_s7 }
   0xb   :  { %421 = vmatpush3.msra.mxu1 %v161_v14  ;;  %438 = vmatpush3.msra.mxu0 %v280_v44  ;;  %v387_v58 = vld [vmem:[%s638_s8] ss:$0 sm:$0xff]  ;;  %s453_s8 = scalar_lea.vmem %s373_s7, 128  ;;  %p458_p1 = scmp.lt.s32.totalorder %s373_s7, %s373_s7 }
   0xc   :  { %422 = vmatprep.subr.mxu1 %v475_v1  ;;  %439 = vmatprep.subr.mxu0 %v475_v1  ;;  %v388_v62 = vld [vmem:[%s640_s10] ss:$0 sm:$0xff]  ;;  %p454_p0 = scmp.ne.s32.totalorder %s373_s7, %s453_s8  ;;  %p459_p2 = scmp.lt.s32.totalorder %s453_s8, %s453_s8 }
   0xd   :  { %423 = vmatpush3.msra.mxu1 %v160_v15  ;;  %440 = vmatpush3.msra.mxu0 %v279_v45 }
   0xe   :  { %424 = vmatprep.subr.mxu1 %v475_v1  ;;  %p460_p3 = por %p459_p2, %p458_p1 }
   0xf   :  { %425 = vmatpush3.msra.mxu1 %v159_v16 }
  0x10   :  { %426 = vmatprep.subr.mxu1 %v475_v1  ;;  %p461_p4 = pnand %p460_p3, %p454_p0 }
  0x11   :  { %427 = vmatpush3.msra.mxu1 %v158_v17 }
  0x12   :  { %428 = vmatprep.subr.mxu1 %v475_v1 }
  0x13   :  { %429 = vmatpush3.msra.mxu1 %v157_v18 }
  0xc5   :  { %v119_v5 = vpop.f32.mrf.mxu0 }
  0xc6   :  { %v120_v6 = vadd.f32 %v380_v4, %v119_v5 }
  0xc7   :  { %v413_v7 = vpop.f32.mrf.mxu0 }
  0xc8   :  { %v126_v8 = vsel %vm125_vm2, %v120_v6, 0.0  ;;  %v129_v9 = vmul.f32 %v120_v6, %v120_v6 }
  0xc9   :  { %127 = vadd.xlane.f32.xlu0 %v126_v8 }
  0xca   :  { %v130_v10 = vsel %vm125_vm2, %v129_v9, 0.0 }
  0xcd   :  { %131 = vadd.xlane.f32.xlu0 %v130_v10 }
 0x152   :  { %v128_v19 = vpop.xlane.xlu0 %127 }
 0x153   :  { %v133_v20 = vmul.f32 0.015625, %v128_v19 }
 0x155   :  { %v135_v22 = vmul.f32 %v133_v20, %v133_v20  ;;  %v140_v27 = vsub.f32 %v120_v6, %v133_v20 }
 0x156   :  { %v132_v21 = vpop.xlane.xlu0 %131 }
 0x157   :  { %v134_v23 = vmul.f32 0.015625, %v132_v21 }
 0x159   :  { %v136_v24 = vsub.f32 %v134_v23, %v135_v22 }
 0x15b   :  { %v137_v25 = vmax.f32 %v136_v24, 0.0 }
 0x15d   :  { %v138_v26 = vadd.f32 1e-05, %v137_v25 }
 0x15f   :  { %447 = vrsqrt.f32 %v138_v26 }
 0x16c   :  { %v448_v28 = vpop.eup %447 }
 0x16d   :  { %v141_v30 = vmul.f32 %v448_v28, %v140_v27 }
 0x16f   :  { %v148_v32 = vmul.f32 %v382_v29, %v141_v30 }
 0x171   :  { %v155_v33 = vadd.f32 %v383_v31, %v148_v32 }
 0x173   :  { %v156_v34 = vmax.f32 %v155_v33, 0.0 }
 0x175   :  { %431 = vmatmul.mubr.msk.f32.vlgmr.msra.gmra.mxu1 %vm125_vm2, %v156_v34 }
 0x235   :  { %v241_v36 = vpop.f32.mrf.mxu1 }
 0x236   :  { %v242_v37 = vadd.f32 %v384_v35, %v241_v36 }
 0x237   :  { %v432_v38 = vpop.f32.mrf.mxu1 }
 0x238   :  { %v248_v39 = vsel %vm247_vm3, %v242_v37, 0.0  ;;  %v251_v40 = vmul.f32 %v242_v37, %v242_v37 }
 0x239   :  { %249 = vadd.xlane.f32.xlu1 %v248_v39 }
 0x23a   :  { %v252_v41 = vsel %vm247_vm3, %v251_v40, 0.0 }
 0x23d   :  { %253 = vadd.xlane.f32.xlu1 %v252_v41 }
 0x2c2   :  { %v250_v46 = vpop.xlane.xlu1 %249 }
 0x2c3   :  { %v255_v47 = vmul.f32 0.03125, %v250_v46 }
 0x2c5   :  { %v257_v49 = vmul.f32 %v255_v47, %v255_v47  ;;  %v262_v54 = vsub.f32 %v242_v37, %v255_v47 }
 0x2c6   :  { %v254_v48 = vpop.xlane.xlu1 %253 }
 0x2c7   :  { %v256_v50 = vmul.f32 0.03125, %v254_v48 }
 0x2c9   :  { %v258_v51 = vsub.f32 %v256_v50, %v257_v49 }
 0x2cb   :  { %v259_v52 = vmax.f32 %v258_v51, 0.0 }
 0x2cd   :  { %v260_v53 = vadd.f32 1e-05, %v259_v52 }
 0x2cf   :  { %449 = vrsqrt.f32 %v260_v53 }
 0x2dc   :  { %v450_v55 = vpop.eup %449 }
 0x2dd   :  { %v263_v57 = vmul.f32 %v450_v55, %v262_v54 }
 0x2df   :  { %v270_v59 = vmul.f32 %v386_v56, %v263_v57 }
 0x2e1   :  { %v277_v60 = vadd.f32 %v387_v58, %v270_v59 }
 0x2e3   :  { %v278_v61 = vmax.f32 %v277_v60, 0.0 }
 0x2e5   :  { %442 = vmatmul.mubr.msk.f32.vlgmr.msra.gmra.mxu0 %vm247_vm3, %v278_v61 }
 0x3a5   :  { %v359_v63 = vpop.f32.mrf.mxu0 }
 0x3a6   :  { %v360_v0 = vadd.f32 %v388_v62, %v359_v63 }
 0x3a7   :  { %v443_v1 = vpop.f32.mrf.mxu0 }
 0x3a8   :  { %451 = vtanh.f32 %v360_v0 }
 0x3b5   :  { %v452_v2 = vpop.eup %451 }
 0x3b6   :  { %365 = vst.msk [vmem:[#allocation2] sm:$0xff] %vm364_vm4, %v452_v2 }
 0x3b7   :  { %464 = shalt.err (!%p461_p4)
}
 0x3b8   :  { %375 = dma.vmem_to_hbm [thread:$0]  %s373_s7, 128, %s641_s11, [#allocation3]  }
 0x3b9   :  { %473 = dma.done.wait [#allocation3], 128  }
 0x3ba   :  { %474 = vsyncadd [#allocation3], 4294967168 }
 0x3bb   :  { %379 = vsyncpa [#allocation3], 1 }

</bundles_post_ra>
